<compile_context>
chip_gen: v7x
topology: tpu7x:2x2x1
jax: 0.10.0
libtpu: 0.0.40
codegen_flags: <defaults>
</compile_context>

<pallas_src>
import functools

import jax
import jax.numpy as jnp
from jax.experimental import pallas as pl
from jax.experimental.pallas import tpu as pltpu

EPS = 1e-5


def _round_up(x, m):
    return (x + m - 1) // m * m


def _vmem_capacity_bytes():
    """Physical VMEM of the local TPU (64 MiB on v7x, 128 MiB on v5e/v6e)."""
    try:
        cap = getattr(pltpu.get_tpu_info(), "vmem_capacity_bytes", None)
        if cap:
            return int(cap)
    except Exception:
        pass
    return 64 * 1024 * 1024  # conservative default (v7x)


def _feature_augmentor_kernel(
    x_ref,    # [TN, in_dim]  bf16  node-feature tile
    w1_ref,   # [in_dim, Dp]  bf16  Linear1 weight (pre-transposed), resident
    w2_ref,   # [Dp, Dp]      bf16  Linear2 weight (pre-transposed), resident
    bn_ref,   # [4, Dp]       f32   rows: g1, be1, g2, be2, resident
    o_ref,    # [TN, Dp]      f32   output tile (written only in phase 2)
    *scratch,
    n_valid, tile_n, needs_mask, cache_acts,
):
    if cache_acts:
        s1_ref, q1_ref, s2_ref, q2_ref, aff_ref, z1c_ref, z2c_ref = scratch
    else:
        s1_ref, q1_ref, s2_ref, q2_ref, aff_ref = scratch

    p = pl.program_id(0)   # phase: 0 = Linear1+stats1, 1 = Linear2+stats2, 2 = BN2+store
    t = pl.program_id(1)   # node tile
    inv_n = 1.0 / n_valid

    # ---------------- helpers ----------------
    def accum(s_ref, q_ref, z, weight=None):
        """Per-feature sum / sum-of-squares: exact f32 VPU reduction (MXU stays free)."""
        zw = z if weight is None else z * weight
        s_ref[...] += jnp.sum(zw, axis=0, keepdims=True)
        q_ref[...] += jnp.sum(zw * z, axis=0, keepdims=True)

    def fold_bn(s_ref, q_ref, g_row, aff_row):
        """Fold training-mode BN (batch stats, biased var) into scale/shift, once per phase."""
        mu = s_ref[...] * inv_n
        # TODO(synk): for very large N, switch to shifted sums / Welford merging to
        # avoid E[x^2]-E[x]^2 cancellation when |mean| >> std.
        var = jnp.maximum(q_ref[...] * inv_n - mu * mu, 0.0)
        scale = bn_ref[g_row:g_row + 1, :] * jax.lax.rsqrt(var + EPS)
        aff_ref[aff_row:aff_row + 1, :] = scale
        aff_ref[aff_row + 1:aff_row + 2, :] = bn_ref[g_row + 1:g_row + 2, :] - mu * scale

    def bn_relu(z, aff_row):
        return jnp.maximum(
            z * aff_ref[aff_row:aff_row + 1, :] + aff_ref[aff_row + 1:aff_row + 2, :], 0.0)

    def linear1():
        # Bias dropped: it cancels exactly under training-mode BN.
        return jnp.dot(x_ref[...], w1_ref[...], preferred_element_type=jnp.float32)

    def linear2(a1):
        return jnp.dot(a1.astype(jnp.bfloat16), w2_ref[...],
                       preferred_element_type=jnp.float32)

    def stats2_weight():
        # [TN, 1] validity weight folded into the layer-2 stats only; padded output
        # rows are sliced off by the wrapper, so no mask on the data path.
        row = t * tile_n + jax.lax.broadcasted_iota(jnp.int32, (tile_n, 1), 0)
        return (row < n_valid).astype(jnp.float32)

    @pl.when((p == 0) & (t == 0))
    def _init():
        s1_ref[...] = jnp.zeros_like(s1_ref)
        q1_ref[...] = jnp.zeros_like(q1_ref)
        s2_ref[...] = jnp.zeros_like(s2_ref)
        q2_ref[...] = jnp.zeros_like(q2_ref)

    if cache_acts:
        # ---- VMEM-resident activations: x read once, each matmul runs once ----
        @pl.when(p == 0)
        def _phase0():
            z1 = linear1()                 # zero-padded rows contribute exactly 0
            z1c_ref[t] = z1
            accum(s1_ref, q1_ref, z1)

        @pl.when(p == 1)
        def _phase1():
            @pl.when(t == 0)
            def _():
                fold_bn(s1_ref, q1_ref, 0, 0)
            z2 = linear2(bn_relu(z1c_ref[t], 0))
            z2c_ref[t] = z2
            accum(s2_ref, q2_ref, z2, stats2_weight() if needs_mask else None)

        @pl.when(p == 2)
        def _phase2():
            @pl.when(t == 0)
            def _():
                fold_bn(s2_ref, q2_ref, 2, 2)
            o_ref[...] = bn_relu(z2c_ref[t], 2).astype(o_ref.dtype)
    else:
        # ---- Streaming fallback: activations too big for VMEM -> recompute ----
        # TODO(synk): for huge N, cache z2 in an HBM side buffer (pl.ANY + manual
        # DMA) instead of recomputing both matmuls in the later phases.
        z1 = linear1()

        @pl.when(p == 0)
        def _phase0():
            accum(s1_ref, q1_ref, z1)

        @pl.when(p >= 1)
        def _phase12():
            @pl.when((p == 1) & (t == 0))
            def _():
                fold_bn(s1_ref, q1_ref, 0, 0)

            @pl.when((p == 2) & (t == 0))
            def _():
                fold_bn(s2_ref, q2_ref, 2, 2)

            z2 = linear2(bn_relu(z1, 0))

            @pl.when(p == 1)
            def _():
                accum(s2_ref, q2_ref, z2, stats2_weight() if needs_mask else None)

            @pl.when(p == 2)
            def _():
                o_ref[...] = bn_relu(z2, 2).astype(o_ref.dtype)


def feature_augmentor(x, params, *, block_n=4096, force_streaming=False):
    """x: [N, in_dim] float32.  Returns [N, out_dim] float32 (training-mode BN)."""
    n, in_dim = x.shape
    out_dim = params["w1"].shape[1]
    d_pad = _round_up(out_dim, 128)          # lane-dense stores, full MXU output lanes

    tile_n = _round_up(min(block_n, _round_up(max(n, 16), 16)), 16)
    n_pad = _round_up(n, tile_n)
    n_tiles = n_pad // tile_n

    # ---- per-generation VMEM budget: keep z1/z2 on-chip iff they fit ----
    cap = _vmem_capacity_bytes()
    cache_bytes = 2 * n_pad * d_pad * 4                       # z1 + z2 scratch (f32)
    fixed_bytes = (
        2 * tile_n * in_dim * 2        # x tile, double-buffered (bf16)
        + 2 * tile_n * d_pad * 4       # out tile, double-buffered (f32)
        + 2 * in_dim * d_pad * 2       # W1 (resident, 2 bufs)
        + 2 * d_pad * d_pad * 2        # W2 (resident, 2 bufs)
        + 2 * 4 * d_pad * 4            # BN params (resident, 2 bufs)
        + 16 * d_pad * 4               # stat / affine scratch
    )
    # TODO(synk): single-buffer the resident W1/W2/bn specs (pipeline_mode=Buffered(1))
    # to reclaim one W2 copy of headroom on v7x's 64 MiB VMEM.
    cache_acts = (not force_streaming) and (cache_bytes + fixed_bytes <= int(0.7 * cap))
    vmem_limit = int(min(
        max(32 * 1024 * 1024,
            fixed_bytes + (cache_bytes if cache_acts else 0) + 16 * 1024 * 1024),
        cap))

    # ---- operands: zero-pad rows to a tile multiple, features to 128 lanes ----
    x_bf = x.astype(jnp.bfloat16)
    if n_pad != n:
        x_bf = jnp.pad(x_bf, ((0, n_pad - n), (0, 0)))
    dp = d_pad - out_dim
    w1 = jnp.pad(params["w1"], ((0, 0), (0, dp))).astype(jnp.bfloat16)
    w2 = jnp.pad(params["w2"], ((0, dp), (0, dp))).astype(jnp.bfloat16)
    # gamma/beta padded with zeros: pad features stay exactly 0 through both layers.
    bn = jnp.pad(
        jnp.stack([params["g1"], params["be1"], params["g2"], params["be2"]], axis=0),
        ((0, 0), (0, dp))).astype(jnp.float32)

    kernel = functools.partial(
        _feature_augmentor_kernel,
        n_valid=n, tile_n=tile_n, needs_mask=(n_pad != n), cache_acts=cache_acts)

    resident = lambda shape: pl.BlockSpec(shape, lambda p, t: (0, 0))
    if cache_acts:
        # x is consumed in phase 0 only; pin its block afterwards -> one HBM pass.
        x_spec = pl.BlockSpec((tile_n, in_dim),
                              lambda p, t: (jnp.where(p == 0, t, 0), 0))
    else:
        x_spec = pl.BlockSpec((tile_n, in_dim), lambda p, t: (t, 0))

    scratch = [pltpu.VMEM((1, d_pad), jnp.float32) for _ in range(4)]    # s1 q1 s2 q2
    scratch.append(pltpu.VMEM((4, d_pad), jnp.float32))                  # scale/shift x2
    if cache_acts:
        scratch += [pltpu.VMEM((n_tiles, tile_n, d_pad), jnp.float32)    # z1, z2 caches
                    for _ in range(2)]

    out = pl.pallas_call(
        kernel,
        out_shape=jax.ShapeDtypeStruct((n_pad, d_pad), jnp.float32),
        grid_spec=pltpu.PrefetchScalarGridSpec(
            num_scalar_prefetch=0,
            grid=(3, n_tiles),                                   # (phase, node-tile)
            in_specs=[
                x_spec,
                resident((in_dim, d_pad)),                       # W1
                resident((d_pad, d_pad)),                        # W2
                resident((4, d_pad)),                            # BN params
            ],
            # Output tiles only exist in phase 2; pin the block index before that so
            # each tile is written back to HBM exactly once (no garbage writebacks).
            out_specs=pl.BlockSpec(
                (tile_n, d_pad), lambda p, t: (jnp.where(p == 2, t, 0), 0)),
            scratch_shapes=scratch),
        compiler_params=pltpu.CompilerParams(
            # Both axes carry sequential state (full-batch BN statistics).
            # TODO(synk): on v7x, split the node-tile axis across the two TensorCores
            # (core_map + CMEM/VMEM_SHARED reduction of the partial s/q stats).
            dimension_semantics=("arbitrary", "arbitrary"),
            vmem_limit_bytes=vmem_limit),
    )(x_bf, w1, w2, bn)

    return out[:n, :out_dim]


def init_params(key, in_dim, out_dim):
    """Synthetic init with nn.Linear / nn.BatchNorm1d shapes (b1/b2 used only by the
    reference: training-mode BN cancels them, so the kernel drops them exactly)."""
    k1, k2, k3, k4 = jax.random.split(key, 4)
    bound1 = 1.0 / (in_dim ** 0.5)
    bound2 = 1.0 / (out_dim ** 0.5)
    return {
        "w1": jax.random.uniform(k1, (in_dim, out_dim), jnp.float32, -bound1, bound1),
        "b1": jax.random.uniform(k2, (out_dim,), jnp.float32, -bound1, bound1),
        "g1": jnp.ones((out_dim,), jnp.float32),
        "be1": jnp.zeros((out_dim,), jnp.float32),
        "w2": jax.random.uniform(k3, (out_dim, out_dim), jnp.float32, -bound2, bound2),
        "b2": jax.random.uniform(k4, (out_dim,), jnp.float32, -bound2, bound2),
        "g2": jnp.ones((out_dim,), jnp.float32),
        "be2": jnp.zeros((out_dim,), jnp.float32),
    }


def _reference(x, p):
    """Pure-JAX reference of the module forward (with biases, canonical BN formulas),
    using the same bf16 storage for x/W1/W2 and the layer-2 matmul input."""
    f32 = jnp.float32
    xb = x.astype(jnp.bfloat16).astype(f32)
    w1 = p["w1"].astype(jnp.bfloat16).astype(f32)
    w2 = p["w2"].astype(jnp.bfloat16).astype(f32)

    h = xb @ w1 + p["b1"]
    mu = h.mean(0, keepdims=True)
    var = ((h - mu) ** 2).mean(0, keepdims=True)
    h = jnp.maximum((h - mu) / jnp.sqrt(var + EPS) * p["g1"] + p["be1"], 0.0)

    h = h.astype(jnp.bfloat16).astype(f32)   # kernel feeds the 2nd MXU matmul in bf16
    h = h @ w2 + p["b2"]
    mu = h.mean(0, keepdims=True)
    var = ((h - mu) ** 2).mean(0, keepdims=True)
    return jnp.maximum((h - mu) / jnp.sqrt(var + EPS) * p["g2"] + p["be2"], 0.0)


if __name__ == "__main__":
    key = jax.random.PRNGKey(0)
    kx, kp = jax.random.split(key)

    # Node count deliberately NOT a tile multiple -> exercises padding + stat masking.
    N, IN_DIM, OUT_DIM = 200, 16, 32
    x = jax.random.normal(kx, (N, IN_DIM), jnp.float32)
    params = init_params(kp, IN_DIM, OUT_DIM)
    ref = _reference(x, params)

    # Primary path: VMEM-resident z1/z2 cache (x read once, each matmul once).
    # block_n=64 -> grid (3 phases, 4 node tiles); production sizes use block_n=4096.
    out = jax.block_until_ready(feature_augmentor(x, params, block_n=64))
    assert out.shape == (N, OUT_DIM)
    assert bool(jnp.all(jnp.isfinite(out)))
    assert jnp.allclose(out, ref, atol=2e-2, rtol=2e-2), \
        float(jnp.max(jnp.abs(out - ref)))

    # Fallback path: streaming recompute (what runs when activations exceed VMEM).
    out_s = jax.block_until_ready(
        feature_augmentor(x, params, block_n=64, force_streaming=True))
    assert jnp.allclose(out_s, ref, atol=2e-2, rtol=2e-2), \
        float(jnp.max(jnp.abs(out_s - ref)))

    print("KERNEL_OK")
</pallas_src>

<mosaic_0001>
module attributes {stable_mosaic.version = 11 : i64} {
  func.func @_feature_augmentor_kernel(%arg0: i32, %arg1: i32, %arg2: memref<64x16xbf16, #tpu.memory_space<vmem>>, %arg3: memref<16x128xbf16, #tpu.memory_space<vmem>>, %arg4: memref<128x128xbf16, #tpu.memory_space<vmem>>, %arg5: memref<4x128xf32, #tpu.memory_space<vmem>>, %arg6: memref<64x128xf32, #tpu.memory_space<vmem>>, %arg7: memref<1x128xf32, #tpu.memory_space<vmem>>, %arg8: memref<1x128xf32, #tpu.memory_space<vmem>>, %arg9: memref<1x128xf32, #tpu.memory_space<vmem>>, %arg10: memref<1x128xf32, #tpu.memory_space<vmem>>, %arg11: memref<4x128xf32, #tpu.memory_space<vmem>>, %arg12: memref<4x64x128xf32, #tpu.memory_space<vmem>>, %arg13: memref<4x64x128xf32, #tpu.memory_space<vmem>>) attributes {dimension_semantics = [#tpu.dimension_semantics<arbitrary>, #tpu.dimension_semantics<arbitrary>], iteration_bounds = array<i64: 3, 4>, scalar_prefetch = 0 : i64, scratch_operands = 7 : i64, tpu.core_type = #tpu.core_type<tc>, window_params = [{transform_indices = @transform_0, window_bounds = array<i64: 64, 16>}, {pipeline_mode = #tpu.pipeline_mode<synchronous>, transform_indices = @transform_1, window_bounds = array<i64: 16, 128>}, {pipeline_mode = #tpu.pipeline_mode<synchronous>, transform_indices = @transform_2, window_bounds = array<i64: 128, 128>}, {pipeline_mode = #tpu.pipeline_mode<synchronous>, transform_indices = @transform_3, window_bounds = array<i64: 4, 128>}, {transform_indices = @transform_4, window_bounds = array<i64: 64, 128>}]} {
    %c0_i32 = arith.constant 0 : i32
    %0 = arith.cmpi eq, %arg0, %c0_i32 : i32
    %c0_i32_0 = arith.constant 0 : i32
    %1 = arith.cmpi eq, %arg1, %c0_i32_0 : i32
    %2 = arith.andi %0, %1 : i1
    %3 = arith.extui %2 : i1 to i32
    %c0_i32_1 = arith.constant 0 : i32
    %4 = arith.cmpi ne, %3, %c0_i32_1 : i32
    scf.if %4 {
      %cst = arith.constant 0.000000e+00 : f32
      %14 = vector.broadcast %cst : f32 to vector<1x128xf32>
      %c0 = arith.constant 0 : index
      %c0_6 = arith.constant 0 : index
      %15 = vector.load %arg7[%c0, %c0_6] : memref<1x128xf32, #tpu.memory_space<vmem>>, vector<1x128xf32>
      tpu.vector_store %arg7[%c0, %c0_6], %14 {strides = array<i32>} : memref<1x128xf32, #tpu.memory_space<vmem>>, vector<1x128xf32>,
      %cst_7 = arith.constant 0.000000e+00 : f32
      %16 = vector.broadcast %cst_7 : f32 to vector<1x128xf32>
      %c0_8 = arith.constant 0 : index
      %c0_9 = arith.constant 0 : index
      %17 = vector.load %arg8[%c0_8, %c0_9] : memref<1x128xf32, #tpu.memory_space<vmem>>, vector<1x128xf32>
      tpu.vector_store %arg8[%c0_8, %c0_9], %16 {strides = array<i32>} : memref<1x128xf32, #tpu.memory_space<vmem>>, vector<1x128xf32>,
      %cst_10 = arith.constant 0.000000e+00 : f32
      %18 = vector.broadcast %cst_10 : f32 to vector<1x128xf32>
      %c0_11 = arith.constant 0 : index
      %c0_12 = arith.constant 0 : index
      %19 = vector.load %arg9[%c0_11, %c0_12] : memref<1x128xf32, #tpu.memory_space<vmem>>, vector<1x128xf32>
      tpu.vector_store %arg9[%c0_11, %c0_12], %18 {strides = array<i32>} : memref<1x128xf32, #tpu.memory_space<vmem>>, vector<1x128xf32>,
      %cst_13 = arith.constant 0.000000e+00 : f32
      %20 = vector.broadcast %cst_13 : f32 to vector<1x128xf32>
      %c0_14 = arith.constant 0 : index
      %c0_15 = arith.constant 0 : index
      %21 = vector.load %arg10[%c0_14, %c0_15] : memref<1x128xf32, #tpu.memory_space<vmem>>, vector<1x128xf32>
      tpu.vector_store %arg10[%c0_14, %c0_15], %20 {strides = array<i32>} : memref<1x128xf32, #tpu.memory_space<vmem>>, vector<1x128xf32>,
    } else {
    }
    %c0_i32_2 = arith.constant 0 : i32
    %5 = arith.cmpi eq, %arg0, %c0_i32_2 : i32
    %6 = arith.extui %5 : i1 to i32
    %c0_i32_3 = arith.constant 0 : i32
    %7 = arith.cmpi ne, %6, %c0_i32_3 : i32
    scf.if %7 {
      %c0 = arith.constant 0 : index
      %c0_6 = arith.constant 0 : index
      %14 = vector.load %arg2[%c0, %c0_6] : memref<64x16xbf16, #tpu.memory_space<vmem>>, vector<64x16xbf16>
      %c0_7 = arith.constant 0 : index
      %c0_8 = arith.constant 0 : index
      %15 = vector.load %arg3[%c0_7, %c0_8] : memref<16x128xbf16, #tpu.memory_space<vmem>>, vector<16x128xbf16>
      %cst = arith.constant dense<0.000000e+00> : vector<64x128xf32>
      %16 = tpu.matmul %14, %15, %cst {dimension_numbers = #tpu.dot_dimension_numbers<[1], [0], [0], [1], [0, 0, 1, 1], [], []>} : vector<64x16xbf16>, vector<16x128xbf16>, vector<64x128xf32> -> vector<64x128xf32>
      %17 = arith.index_cast %arg1 : i32 to index
      %c0_9 = arith.constant 0 : index
      %c0_10 = arith.constant 0 : index
      %18 = vector.load %arg12[%17, %c0_9, %c0_10] : memref<4x64x128xf32, #tpu.memory_space<vmem>>, vector<1x64x128xf32>
      %19 = vector.shape_cast %18 : vector<1x64x128xf32> to vector<64x128xf32>
      %20 = vector.shape_cast %16 : vector<64x128xf32> to vector<1x64x128xf32>
      tpu.vector_store %arg12[%17, %c0_9, %c0_10], %20 {strides = array<i32>} : memref<4x64x128xf32, #tpu.memory_space<vmem>>, vector<1x64x128xf32>,
      %c0_11 = arith.constant 0 : index
      %c0_12 = arith.constant 0 : index
      %21 = vector.load %arg7[%c0_11, %c0_12] : memref<1x128xf32, #tpu.memory_space<vmem>>, vector<1x128xf32>
      %cst_13 = arith.constant dense<0.000000e+00> : vector<128xf32>
      %22 = vector.multi_reduction <add>, %16, %cst_13 [0] : vector<64x128xf32> to vector<128xf32>
      %23 = vector.shape_cast %22 : vector<128xf32> to vector<1x128xf32>
      %24 = arith.addf %21, %23 : vector<1x128xf32>
      %c0_14 = arith.constant 0 : index
      %c0_15 = arith.constant 0 : index
      %25 = vector.load %arg7[%c0_14, %c0_15] : memref<1x128xf32, #tpu.memory_space<vmem>>, vector<1x128xf32>
      tpu.vector_store %arg7[%c0_14, %c0_15], %24 {strides = array<i32>} : memref<1x128xf32, #tpu.memory_space<vmem>>, vector<1x128xf32>,
      %c0_16 = arith.constant 0 : index
      %c0_17 = arith.constant 0 : index
      %26 = vector.load %arg8[%c0_16, %c0_17] : memref<1x128xf32, #tpu.memory_space<vmem>>, vector<1x128xf32>
      %27 = arith.mulf %16, %16 : vector<64x128xf32>
      %cst_18 = arith.constant dense<0.000000e+00> : vector<128xf32>
      %28 = vector.multi_reduction <add>, %27, %cst_18 [0] : vector<64x128xf32> to vector<128xf32>
      %29 = vector.shape_cast %28 : vector<128xf32> to vector<1x128xf32>
      %30 = arith.addf %26, %29 : vector<1x128xf32>
      %c0_19 = arith.constant 0 : index
      %c0_20 = arith.constant 0 : index
      %31 = vector.load %arg8[%c0_19, %c0_20] : memref<1x128xf32, #tpu.memory_space<vmem>>, vector<1x128xf32>
      tpu.vector_store %arg8[%c0_19, %c0_20], %30 {strides = array<i32>} : memref<1x128xf32, #tpu.memory_space<vmem>>, vector<1x128xf32>,
    } else {
    }
    %c1_i32 = arith.constant 1 : i32
    %8 = arith.cmpi eq, %arg0, %c1_i32 : i32
    %9 = arith.extui %8 : i1 to i32
    %c0_i32_4 = arith.constant 0 : i32
    %10 = arith.cmpi ne, %9, %c0_i32_4 : i32
    scf.if %10 {
      %c0_i32_6 = arith.constant 0 : i32
      %14 = arith.cmpi eq, %arg1, %c0_i32_6 : i32
      %15 = arith.extui %14 : i1 to i32
      %c0_i32_7 = arith.constant 0 : i32
      %16 = arith.cmpi ne, %15, %c0_i32_7 : i32
      scf.if %16 {
        %c0_27 = arith.constant 0 : index
        %c0_28 = arith.constant 0 : index
        %56 = vector.load %arg7[%c0_27, %c0_28] : memref<1x128xf32, #tpu.memory_space<vmem>>, vector<1x128xf32>
        %cst_29 = arith.constant 5.000000e-03 : f32
        %57 = vector.broadcast %cst_29 : f32 to vector<1x128xf32>
        %58 = arith.mulf %56, %57 : vector<1x128xf32>
        %c0_30 = arith.constant 0 : index
        %c0_31 = arith.constant 0 : index
        %59 = vector.load %arg8[%c0_30, %c0_31] : memref<1x128xf32, #tpu.memory_space<vmem>>, vector<1x128xf32>
        %cst_32 = arith.constant 5.000000e-03 : f32
        %60 = vector.broadcast %cst_32 : f32 to vector<1x128xf32>
        %61 = arith.mulf %59, %60 : vector<1x128xf32>
        %62 = arith.mulf %58, %58 : vector<1x128xf32>
        %63 = arith.subf %61, %62 : vector<1x128xf32>
        %cst_33 = arith.constant 0.000000e+00 : f32
        %64 = vector.broadcast %cst_33 : f32 to vector<1x128xf32>
        %65 = arith.maximumf %63, %64 : vector<1x128xf32>
        %c0_34 = arith.constant 0 : index
        %c0_35 = arith.constant 0 : index
        %66 = vector.load %arg5[%c0_34, %c0_35] : memref<4x128xf32, #tpu.memory_space<vmem>>, vector<1x128xf32>
        %cst_36 = arith.constant 9.99999974E-6 : f32
        %67 = vector.broadcast %cst_36 : f32 to vector<1x128xf32>
        %68 = arith.addf %65, %67 : vector<1x128xf32>
        %69 = math.rsqrt %68 : vector<1x128xf32>
        %70 = arith.mulf %66, %69 : vector<1x128xf32>
        %c0_37 = arith.constant 0 : index
        %c0_38 = arith.constant 0 : index
        %71 = vector.load %arg11[%c0_37, %c0_38] : memref<4x128xf32, #tpu.memory_space<vmem>>, vector<1x128xf32>
        tpu.vector_store %arg11[%c0_37, %c0_38], %70 {strides = array<i32>} : memref<4x128xf32, #tpu.memory_space<vmem>>, vector<1x128xf32>,
        %c1_39 = arith.constant 1 : index
        %c0_40 = arith.constant 0 : index
        %72 = vector.load %arg5[%c1_39, %c0_40] : memref<4x128xf32, #tpu.memory_space<vmem>>, vector<1x128xf32>
        %73 = arith.mulf %58, %70 : vector<1x128xf32>
        %74 = arith.subf %72, %73 : vector<1x128xf32>
        %c1_41 = arith.constant 1 : index
        %c0_42 = arith.constant 0 : index
        %75 = vector.load %arg11[%c1_41, %c0_42] : memref<4x128xf32, #tpu.memory_space<vmem>>, vector<1x128xf32>
        tpu.vector_store %arg11[%c1_41, %c0_42], %74 {strides = array<i32>} : memref<4x128xf32, #tpu.memory_space<vmem>>, vector<1x128xf32>,
      } else {
      }
      %17 = arith.index_cast %arg1 : i32 to index
      %c0 = arith.constant 0 : index
      %c0_8 = arith.constant 0 : index
      %18 = vector.load %arg12[%17, %c0, %c0_8] : memref<4x64x128xf32, #tpu.memory_space<vmem>>, vector<1x64x128xf32>
      %19 = vector.shape_cast %18 : vector<1x64x128xf32> to vector<64x128xf32>
      %c0_9 = arith.constant 0 : index
      %c0_10 = arith.constant 0 : index
      %20 = vector.load %arg11[%c0_9, %c0_10] : memref<4x128xf32, #tpu.memory_space<vmem>>, vector<1x128xf32>
      %21 = vector.broadcast %20 : vector<1x128xf32> to vector<64x128xf32>
      %22 = arith.mulf %19, %21 : vector<64x128xf32>
      %c1 = arith.constant 1 : index
      %c0_11 = arith.constant 0 : index
      %23 = vector.load %arg11[%c1, %c0_11] : memref<4x128xf32, #tpu.memory_space<vmem>>, vector<1x128xf32>
      %24 = vector.broadcast %23 : vector<1x128xf32> to vector<64x128xf32>
      %25 = arith.addf %22, %24 : vector<64x128xf32>
      %cst = arith.constant 0.000000e+00 : f32
      %26 = vector.broadcast %cst : f32 to vector<64x128xf32>
      %27 = arith.maximumf %25, %26 : vector<64x128xf32>
      %28 = arith.truncf %27 : vector<64x128xf32> to vector<64x128xbf16>
      %c0_12 = arith.constant 0 : index
      %c0_13 = arith.constant 0 : index
      %29 = vector.load %arg4[%c0_12, %c0_13] : memref<128x128xbf16, #tpu.memory_space<vmem>>, vector<128x128xbf16>
      %cst_14 = arith.constant dense<0.000000e+00> : vector<64x128xf32>
      %30 = tpu.matmul %28, %29, %cst_14 {dimension_numbers = #tpu.dot_dimension_numbers<[1], [0], [0], [1], [0, 0, 1, 1], [], []>} : vector<64x128xbf16>, vector<128x128xbf16>, vector<64x128xf32> -> vector<64x128xf32>
      %31 = arith.index_cast %arg1 : i32 to index
      %c0_15 = arith.constant 0 : index
      %c0_16 = arith.constant 0 : index
      %32 = vector.load %arg13[%31, %c0_15, %c0_16] : memref<4x64x128xf32, #tpu.memory_space<vmem>>, vector<1x64x128xf32>
      %33 = vector.shape_cast %32 : vector<1x64x128xf32> to vector<64x128xf32>
      %34 = vector.shape_cast %30 : vector<64x128xf32> to vector<1x64x128xf32>
      tpu.vector_store %arg13[%31, %c0_15, %c0_16], %34 {strides = array<i32>} : memref<4x64x128xf32, #tpu.memory_space<vmem>>, vector<1x64x128xf32>,
      %c64_i32 = arith.constant 64 : i32
      %35 = arith.muli %arg1, %c64_i32 : i32
      %36 = tpu.iota {dimensions = array<i32: 0>} : vector<64x1xi32>
      %37 = vector.broadcast %35 : i32 to vector<64x1xi32>
      %38 = arith.addi %37, %36 : vector<64x1xi32>
      %c200_i32 = arith.constant 200 : i32
      %39 = vector.broadcast %c200_i32 : i32 to vector<64x1xi32>
      %40 = arith.cmpi slt, %38, %39 : vector<64x1xi32>
      %41 = arith.extui %40 : vector<64x1xi1> to vector<64x1xi32>
      %42 = arith.sitofp %41 : vector<64x1xi32> to vector<64x1xf32>
      %43 = vector.broadcast %42 : vector<64x1xf32> to vector<64x128xf32>
      %44 = arith.mulf %30, %43 : vector<64x128xf32>
      %c0_17 = arith.constant 0 : index
      %c0_18 = arith.constant 0 : index
      %45 = vector.load %arg9[%c0_17, %c0_18] : memref<1x128xf32, #tpu.memory_space<vmem>>, vector<1x128xf32>
      %cst_19 = arith.constant dense<0.000000e+00> : vector<128xf32>
      %46 = vector.multi_reduction <add>, %44, %cst_19 [0] : vector<64x128xf32> to vector<128xf32>
      %47 = vector.shape_cast %46 : vector<128xf32> to vector<1x128xf32>
      %48 = arith.addf %45, %47 : vector<1x128xf32>
      %c0_20 = arith.constant 0 : index
      %c0_21 = arith.constant 0 : index
      %49 = vector.load %arg9[%c0_20, %c0_21] : memref<1x128xf32, #tpu.memory_space<vmem>>, vector<1x128xf32>
      tpu.vector_store %arg9[%c0_20, %c0_21], %48 {strides = array<i32>} : memref<1x128xf32, #tpu.memory_space<vmem>>, vector<1x128xf32>,
      %c0_22 = arith.constant 0 : index
      %c0_23 = arith.constant 0 : index
      %50 = vector.load %arg10[%c0_22, %c0_23] : memref<1x128xf32, #tpu.memory_space<vmem>>, vector<1x128xf32>
      %51 = arith.mulf %44, %30 : vector<64x128xf32>
      %cst_24 = arith.constant dense<0.000000e+00> : vector<128xf32>
      %52 = vector.multi_reduction <add>, %51, %cst_24 [0] : vector<64x128xf32> to vector<128xf32>
      %53 = vector.shape_cast %52 : vector<128xf32> to vector<1x128xf32>
      %54 = arith.addf %50, %53 : vector<1x128xf32>
      %c0_25 = arith.constant 0 : index
      %c0_26 = arith.constant 0 : index
      %55 = vector.load %arg10[%c0_25, %c0_26] : memref<1x128xf32, #tpu.memory_space<vmem>>, vector<1x128xf32>
      tpu.vector_store %arg10[%c0_25, %c0_26], %54 {strides = array<i32>} : memref<1x128xf32, #tpu.memory_space<vmem>>, vector<1x128xf32>,
    } else {
    }
    %c2_i32 = arith.constant 2 : i32
    %11 = arith.cmpi eq, %arg0, %c2_i32 : i32
    %12 = arith.extui %11 : i1 to i32
    %c0_i32_5 = arith.constant 0 : i32
    %13 = arith.cmpi ne, %12, %c0_i32_5 : i32
    scf.if %13 {
      %c0_i32_6 = arith.constant 0 : i32
      %14 = arith.cmpi eq, %arg1, %c0_i32_6 : i32
      %15 = arith.extui %14 : i1 to i32
      %c0_i32_7 = arith.constant 0 : i32
      %16 = arith.cmpi ne, %15, %c0_i32_7 : i32
      scf.if %16 {
        %c0_13 = arith.constant 0 : index
        %c0_14 = arith.constant 0 : index
        %29 = vector.load %arg9[%c0_13, %c0_14] : memref<1x128xf32, #tpu.memory_space<vmem>>, vector<1x128xf32>
        %cst_15 = arith.constant 5.000000e-03 : f32
        %30 = vector.broadcast %cst_15 : f32 to vector<1x128xf32>
        %31 = arith.mulf %29, %30 : vector<1x128xf32>
        %c0_16 = arith.constant 0 : index
        %c0_17 = arith.constant 0 : index
        %32 = vector.load %arg10[%c0_16, %c0_17] : memref<1x128xf32, #tpu.memory_space<vmem>>, vector<1x128xf32>
        %cst_18 = arith.constant 5.000000e-03 : f32
        %33 = vector.broadcast %cst_18 : f32 to vector<1x128xf32>
        %34 = arith.mulf %32, %33 : vector<1x128xf32>
        %35 = arith.mulf %31, %31 : vector<1x128xf32>
        %36 = arith.subf %34, %35 : vector<1x128xf32>
        %cst_19 = arith.constant 0.000000e+00 : f32
        %37 = vector.broadcast %cst_19 : f32 to vector<1x128xf32>
        %38 = arith.maximumf %36, %37 : vector<1x128xf32>
        %c2_20 = arith.constant 2 : index
        %c0_21 = arith.constant 0 : index
        %39 = vector.load %arg5[%c2_20, %c0_21] : memref<4x128xf32, #tpu.memory_space<vmem>>, vector<1x128xf32>
        %cst_22 = arith.constant 9.99999974E-6 : f32
        %40 = vector.broadcast %cst_22 : f32 to vector<1x128xf32>
        %41 = arith.addf %38, %40 : vector<1x128xf32>
        %42 = math.rsqrt %41 : vector<1x128xf32>
        %43 = arith.mulf %39, %42 : vector<1x128xf32>
        %c2_23 = arith.constant 2 : index
        %c0_24 = arith.constant 0 : index
        %44 = vector.load %arg11[%c2_23, %c0_24] : memref<4x128xf32, #tpu.memory_space<vmem>>, vector<1x128xf32>
        tpu.vector_store %arg11[%c2_23, %c0_24], %43 {strides = array<i32>} : memref<4x128xf32, #tpu.memory_space<vmem>>, vector<1x128xf32>,
        %c3_25 = arith.constant 3 : index
        %c0_26 = arith.constant 0 : index
        %45 = vector.load %arg5[%c3_25, %c0_26] : memref<4x128xf32, #tpu.memory_space<vmem>>, vector<1x128xf32>
        %46 = arith.mulf %31, %43 : vector<1x128xf32>
        %47 = arith.subf %45, %46 : vector<1x128xf32>
        %c3_27 = arith.constant 3 : index
        %c0_28 = arith.constant 0 : index
        %48 = vector.load %arg11[%c3_27, %c0_28] : memref<4x128xf32, #tpu.memory_space<vmem>>, vector<1x128xf32>
        tpu.vector_store %arg11[%c3_27, %c0_28], %47 {strides = array<i32>} : memref<4x128xf32, #tpu.memory_space<vmem>>, vector<1x128xf32>,
      } else {
      }
      %17 = arith.index_cast %arg1 : i32 to index
      %c0 = arith.constant 0 : index
      %c0_8 = arith.constant 0 : index
      %18 = vector.load %arg13[%17, %c0, %c0_8] : memref<4x64x128xf32, #tpu.memory_space<vmem>>, vector<1x64x128xf32>
      %19 = vector.shape_cast %18 : vector<1x64x128xf32> to vector<64x128xf32>
      %c2 = arith.constant 2 : index
      %c0_9 = arith.constant 0 : index
      %20 = vector.load %arg11[%c2, %c0_9] : memref<4x128xf32, #tpu.memory_space<vmem>>, vector<1x128xf32>
      %21 = vector.broadcast %20 : vector<1x128xf32> to vector<64x128xf32>
      %22 = arith.mulf %19, %21 : vector<64x128xf32>
      %c3 = arith.constant 3 : index
      %c0_10 = arith.constant 0 : index
      %23 = vector.load %arg11[%c3, %c0_10] : memref<4x128xf32, #tpu.memory_space<vmem>>, vector<1x128xf32>
      %24 = vector.broadcast %23 : vector<1x128xf32> to vector<64x128xf32>
      %25 = arith.addf %22, %24 : vector<64x128xf32>
      %cst = arith.constant 0.000000e+00 : f32
      %26 = vector.broadcast %cst : f32 to vector<64x128xf32>
      %27 = arith.maximumf %25, %26 : vector<64x128xf32>
      %c0_11 = arith.constant 0 : index
      %c0_12 = arith.constant 0 : index
      %28 = vector.load %arg6[%c0_11, %c0_12] : memref<64x128xf32, #tpu.memory_space<vmem>>, vector<64x128xf32>
      tpu.vector_store %arg6[%c0_11, %c0_12], %27 {strides = array<i32>} : memref<64x128xf32, #tpu.memory_space<vmem>>, vector<64x128xf32>,
    } else {
    }
    return
  }
  func.func @transform_0(%arg0: i32, %arg1: i32) -> (i32, i32) {
    %c0_i32 = arith.constant 0 : i32
    %0 = arith.cmpi eq, %arg0, %c0_i32 : i32
    %c0_i32_0 = arith.constant 0 : i32
    %1 = arith.select %0, %arg1, %c0_i32_0 : i32
    %c0_i32_1 = arith.constant 0 : i32
    %c0_i32_2 = arith.constant 0 : i32
    return %1, %c0_i32_1 : i32, i32
  }
  func.func @transform_1(%arg0: i32, %arg1: i32) -> (i32, i32) {
    %c0_i32 = arith.constant 0 : i32
    %c0_i32_0 = arith.constant 0 : i32
    %c0_i32_1 = arith.constant 0 : i32
    return %c0_i32, %c0_i32_0 : i32, i32
  }
  func.func @transform_2(%arg0: i32, %arg1: i32) -> (i32, i32) {
    %c0_i32 = arith.constant 0 : i32
    %c0_i32_0 = arith.constant 0 : i32
    %c0_i32_1 = arith.constant 0 : i32
    return %c0_i32, %c0_i32_0 : i32, i32
  }
  func.func @transform_3(%arg0: i32, %arg1: i32) -> (i32, i32) {
    %c0_i32 = arith.constant 0 : i32
    %c0_i32_0 = arith.constant 0 : i32
    %c0_i32_1 = arith.constant 0 : i32
    return %c0_i32, %c0_i32_0 : i32, i32
  }
  func.func @transform_4(%arg0: i32, %arg1: i32) -> (i32, i32) {
    %c2_i32 = arith.constant 2 : i32
    %0 = arith.cmpi eq, %arg0, %c2_i32 : i32
    %c0_i32 = arith.constant 0 : i32
    %1 = arith.select %0, %arg1, %c0_i32 : i32
    %c0_i32_0 = arith.constant 0 : i32
    %c0_i32_1 = arith.constant 0 : i32
    return %1, %c0_i32_0 : i32, i32
  }
}

</mosaic_0001>

<bundles_post_ra>
// kernel: tpu_custom_call.1
= control target key start
LH: loop header
LB: loop body
LE: loop exit
PB: predicated region body
PF: predicated region fallthrough
CT: control target
= control target key end

     0   :  { %9 = vsyncpa [#allocation10], 0  ;;  %s1425_s0 = inlined_call_operand.vmem [shape: bf16[256,16], index: 0, kind: input, shape index: {}]   ;;  %s1426_s1 = inlined_call_operand.vmem [shape: bf16[16,128], index: 1, kind: input, shape index: {}]   ;;  %s1427_s2 = inlined_call_operand.vmem [shape: bf16[128,128], index: 2, kind: input, shape index: {}]   ;;  %s1428_s3 = inlined_call_operand.vmem [shape: f32[4,128], index: 3, kind: input, shape index: {}]   ;;  %s1429_s4 = inlined_call_operand.hbm [shape: f32[256,128], index: 4, kind: output, shape index: {}]  }
   0x1   :  { %11 = vsyncpa [#allocation10 + $0x1], 0  ;;  %s1218_s15 = smov 0   ;;  %s1220_s16 = smov 0  }
   0x2   :  { %s1222_s17 = smov 0   ;;  %s1224_s18 = smov 0  }
   0x3   :  { %s1226_s19 = smov 0   ;;  %s1228_s20 = smov 0  }
   0x4   :  { %s1230_s21 = smov 0   ;;  %s1232_s22 = smov 0  }
   0x5 LB: > { %s880_s23 = sadd.s32 4294967295, %s1186_s22   ;;  %s26_s24 = sadd.s32 1, %s1178_s20  ;;  %s1186_s22 = sphi %s1232_s22, %s17_s22   ;;  %s1182_s21 = sphi %s1230_s21, %s1438_s21   ;;  %s1178_s20 = sphi %s1228_s20, %s1437_s20   ;;  %s1174_s19 = sphi %s1226_s19, %s1436_s19   ;;  %s1170_s18 = sphi %s1224_s18, %s1435_s18   ;;  %s1166_s17 = sphi %s1222_s17, %s1434_s17   ;;  %s1162_s16 = sphi %s1220_s16, %s1433_s16   ;;  %s1158_s15 = sphi %s1218_s15, %s1432_s15  }
   0x6   : > { %s29_s25 = sadd.s32 1, %s1182_s21  ;;  %p27_p0 = scmp.ge.s32.totalorder %s26_s24, 4 }
   0x7   : > { %p126_p1 = scmp.eq.s32.totalorder %s1182_s21, 2  ;;  %s881_s26 = sadd.s32 4294967294, %s1186_s22  }
   0x8   : > { %p143_p2 = scmp.ne.s32.totalorder %s1166_s17, %s1162_s16  ;;  %s1440_s24 = smov (%p27_p0, %s26_s24), 0 }
   0x9   : > { %s1442_s25 = smov (!%p27_p0, %s29_s25), %s1182_s21  ;;  %p144_p4 = scmp.eq.s32.totalorder %s880_s23, 11 }
   0xa   : > { %s127_s27 = scalar_select %p126_p1, %s1178_s20, 0 }
   0xb   : > { %p31_p3 = scmp.ge.s32.totalorder %s1442_s25, 3  ;;  %p149_p5 = scmp.ne.s32.totalorder %s1162_s16, %s1158_s15 }
   0xc   : > { %p150_p6 = scmp.eq.s32.totalorder %s881_s26, 11  ;;  %p1273_p7 = por %p144_p4, %p143_p2 }
   0xd   : > { %s1444_s25 = smov (%p31_p3, %s1442_s25), 0  ;;  %p884_p10 = scmp.ge.s32.totalorder %s1186_s22, 1 }
   0xe   : > { %p1277_p8 = por %p150_p6, %p149_p5  ;;  %p128_p9 = scmp.eq.s32.totalorder %s1444_s25, 2 }
   0xf   : > { %p190_p11 = scmp.lt.s32.totalorder %s1186_s22, 13  ;;  %s133_s6 = sadd.s32 1, %s1166_s17 }
  0x10   : > { %s129_s30 = scalar_select %p128_p9, %s1440_s24, 0 }
  0x11   : > { %p191_p12 = pnand %p884_p10, %p190_p11 }
  0x12   : > { %s130_s5 = ssub.s32 %s127_s27, %s129_s30  ;;  %s215_s8 = sand.u32 (!%p191_p12), 1, %s1162_s16  }
  0x13   : > { %p131_p13 = scmp.eq.s32.totalorder %s130_s5, 0  ;;  %194 = sbr.rel (%p191_p12) target bundleno = 685 (0x2ad), region = 36 }
  0x14   : > { %p218_p0 = scmp.eq.s32.totalorder (!%p191_p12), %s1174_s19, 0  ;;  %s885_s9 = sshll.u32 (!%p191_p12), %s215_s8, 6 }
  0x15   : > { %s1287_s7 = scalar_select %p131_p13, %s1166_s17, %s133_s6  }
  0x16   : > { %p233_p1 = scmp.eq.s32.totalorder (!%p191_p12), %s1170_s18, 0  ;;  %s1298_s26 = scalar_lea.vmem (!%p191_p12), [#allocation9], %s885_s9 }
  0x18   : > { %p234_p2 = pnand (!%p191_p12), %p233_p1, %p218_p0 }
  0x1a   : > { %s219_s10 = scalar_select %p218_p0, %s1170_s18, 0 }
  0x1b   : > { %237 = sbr.rel (%p234_p2) target bundleno = 34 (0x22), region = 40  ;;  %v1188_v0 = vmov (!%p234_p2), 0.0  }
  0x1c   : > { %s886_s11 = sshll.u32 %s219_s10, 3  ;;  %238 = vst [vmem:[#allocation2] sm:$0x1] (!%p234_p2), %v1188_v0  ;;  %239 = vst [vmem:[#allocation3] sm:$0x1] (!%p234_p2), %v1188_v0 }
  0x1d   : > { %p221_p3 = scmp.lt.s32.totalorder %s886_s11, 31  ;;  %240 = vst [vmem:[#allocation4] sm:$0x1] (!%p234_p2), %v1188_v0  ;;  %241 = vst [vmem:[#allocation5] sm:$0x1] (!%p234_p2), %v1188_v0 }
  0x1f   : > { %s1446_s11 = smov (!%p221_p3, %s886_s11), 31 }
  0x20   : > { %s887_s12 = sshll.u32 %s1446_s11, 2 }
  0x21   : > { %s224_s23 = scalar_lea.vmem %s1425_s0, %s887_s12 }
  0x22 PF: > { %p888_p4 = scmp.ne.s32.totalorder %s1174_s19, 0 }
  0x23   : > { %v1075_v1 = vld [vmem:[%s1426_s1] sm:$0xff] (!%p888_p4)   ;;  %vm281_vm0 = vcmask (!%p888_p4), 130048   ;;  %v1077_v3 = vld [vmem:[%s224_s23 + $0x8] sm:$0xff] (!%p888_p4)   ;;  %v1078_v4 = vld [vmem:[%s224_s23 + $0x10] sm:$0xff] (!%p888_p4)   ;;  %s898_s5 = sshll.u32 (!%p888_p4), %s1170_s18, 6 }
  0x24   : > { %244 = sbr.rel (%p888_p4) target bundleno = 286 (0x11e), region = 44  ;;  %v1076_v2 = vld [vmem:[%s224_s23] sm:$0xff] (!%p888_p4)   ;;  %948 = vmatprep.subr.bf16.mxu0 (!%p888_p4), %v1075_v1  ;;  %982 = vmatprep.subr.bf16.mxu1 (!%p888_p4), %v1075_v1  ;;  %v1079_v5 = vld [vmem:[%s224_s23 + $0x18] sm:$0xff] (!%p888_p4)   ;;  %s360_s6 = scalar_lea.vmem (!%p888_p4), [#allocation7], %s898_s5 }
  0x25   : > { %949 = vmatpush3.bf16.msra.mxu0 (!%p888_p4), %v1075_v1  ;;  %950 = vmatprep.mubr.msk.bf16.mxu0 (!%p888_p4), %vm281_vm0, %v1076_v2  ;;  %v369_v45 = vld [vmem:[#allocation2] sm:$0x1] (!%p888_p4)  ;;  %v385_v48 = vld [vmem:[#allocation3] sm:$0x1] (!%p888_p4) }
  0x26   : > { %983 = vmatpush3.bf16.msra.mxu1 (!%p888_p4), %v1075_v1  ;;  %954 = vmatprep.mubr.msk.bf16.mxu1 (!%p888_p4), %vm281_vm0, %v1078_v4 }
  0x28   : > { %951 = vmatmul.mubr.msk.bf16.vlgmr.msra.gmra.mrb[0].mxu0 (!%p888_p4), %vm281_vm0, %v1077_v3 }
  0x29   : > { %955 = vmatmul.mubr.msk.bf16.vlgmr.msra.gmra.mrb[0].mxu1 (!%p888_p4), %vm281_vm0, %v1079_v5 }
  0xfb   : > { %v952_v6 = vpop.f32.mrb[0].mxu0 }
  0xfc   : > { %363 = vst [vmem:[%s360_s6 + $0x10] sm:$0xff] %v952_v6  ;;  %v328_v7 = vpop.f32.mrb[1].mxu0  ;;  %v956_v8 = vpop.f32.mrb[0].mxu1  ;;  %v388_v17 = vmul.f32 %v952_v6, %v952_v6 }
  0xfd   : > { %361 = vst [vmem:[%s360_s6] sm:$0xff] %v328_v7  ;;  %v953_v9 = vpop.f32.mrb[2].mxu0  ;;  %367 = vst [vmem:[%s360_s6 + $0x30] sm:$0xff] %v956_v8  ;;  %v344_v10 = vpop.f32.mrb[1].mxu1  ;;  %v386_v13 = vmul.f32 %v328_v7, %v328_v7  ;;  %v392_v29 = vmul.f32 %v956_v8, %v956_v8 }
  0xfe   : > { %364 = vst [vmem:[%s360_s6 + $0x18] sm:$0xff] %v953_v9  ;;  %v331_v11 = vpop.f32.mrb[3].mxu0  ;;  %365 = vst [vmem:[%s360_s6 + $0x20] sm:$0xff] %v344_v10  ;;  %v957_v12 = vpop.f32.mrb[2].mxu1  ;;  %v389_v20 = vmul.f32 %v953_v9, %v953_v9  ;;  %v390_v23 = vmul.f32 %v344_v10, %v344_v10 }
  0xff   : > { %362 = vst [vmem:[%s360_s6 + $0x8] sm:$0xff] %v331_v11  ;;  %v370_v14 = vadd.f32 %v331_v11, %v328_v7  ;;  %v387_v15 = vmul.f32 %v331_v11, %v331_v11  ;;  %368 = vst [vmem:[%s360_s6 + $0x38] sm:$0xff] %v957_v12  ;;  %v347_v16 = vpop.f32.mrb[3].mxu1  ;;  %v393_v32 = vmul.f32 %v957_v12, %v957_v12 }
 0x100   : > { %366 = vst [vmem:[%s360_s6 + $0x28] sm:$0xff] %v347_v16  ;;  %v391_v28 = vmul.f32 %v347_v16, %v347_v16 }
 0x101   : > { %v371_v18 = vadd.f32 %v952_v6, %v370_v14  ;;  %v394_v19 = vadd.f32 %v387_v15, %v386_v13 }
 0x103   : > { %v395_v21 = vadd.f32 %v394_v19, %v388_v17  ;;  %v372_v22 = vadd.f32 %v953_v9, %v371_v18 }
 0x105   : > { %v373_v24 = vadd.f32 %v372_v22, %v344_v10  ;;  %v396_v25 = vadd.f32 %v395_v21, %v389_v20 }
 0x107   : > { %v397_v26 = vadd.f32 %v396_v25, %v390_v23  ;;  %v374_v27 = vadd.f32 %v373_v24, %v347_v16 }
 0x109   : > { %v375_v30 = vadd.f32 %v956_v8, %v374_v27  ;;  %v398_v31 = vadd.f32 %v397_v26, %v391_v28 }
 0x10b   : > { %v376_v33 = vadd.f32 %v957_v12, %v375_v30  ;;  %v399_v34 = vadd.f32 %v398_v31, %v392_v29 }
 0x10d   : > { %v377_v35 = vrot.slane %v376_v33, 4  ;;  %v400_v36 = vadd.f32 %v399_v34, %v393_v32 }
 0x10f   : > { %v378_v37 = vadd.f32 %v377_v35, %v376_v33  ;;  %v401_v38 = vrot.slane %v400_v36, 4 }
 0x111   : > { %v379_v39 = vrot.slane %v378_v37, 2  ;;  %v402_v40 = vadd.f32 %v401_v38, %v400_v36 }
 0x113   : > { %v380_v41 = vadd.f32 %v379_v39, %v378_v37  ;;  %v403_v42 = vrot.slane %v402_v40, 2 }
 0x115   : > { %v381_v43 = vrot.slane %v380_v41, 1  ;;  %v404_v44 = vadd.f32 %v403_v42, %v402_v40 }
 0x117   : > { %v382_v46 = vadd.f32 %v381_v43, %v380_v41  ;;  %v405_v47 = vrot.slane %v404_v44, 1 }
 0x119   : > { %v383_v49 = vadd.f32 %v382_v46, %v369_v45  ;;  %v406_v50 = vadd.f32 %v405_v47, %v404_v44 }
 0x11b   : > { %384 = vst [vmem:[#allocation2] sm:$0x1] %v383_v49  ;;  %v407_v51 = vadd.f32 %v406_v50, %v385_v48 }
 0x11d   : > { %408 = vst [vmem:[#allocation3] sm:$0x1] %v407_v51 }
 0x11e PF: > { %p899_p5 = scmp.ne.s32.totalorder %s1174_s19, 1 }
 0x11f   : > { %p900_p6 = scmp.ne.s32.totalorder (!%p899_p5), %s1170_s18, 0 }
 0x120   : > { %412 = sbr.rel (%p899_p5) target bundleno = 605 (0x25d), region = 48 }
 0x127   : > { %415 = sbr.rel (%p900_p6) target bundleno = 324 (0x144), region = 52  ;;  %v416_v52 = vld [vmem:[#allocation2] sm:$0x1] (!%p900_p6)  ;;  %v418_v53 = vld [vmem:[#allocation3] sm:$0x1] (!%p900_p6) }
 0x128   : > { %v417_v54 = vmul.f32 (!%p900_p6), 0.005, %v416_v52  ;;  %v419_v55 = vmul.f32 (!%p900_p6), 0.005, %v418_v53  ;;  %v423_v60 = vld [vmem:[%s1428_s3] sm:$0x1] (!%p900_p6) }
 0x129   : > { %v428_v63 = vld [vmem:[%s1428_s3 + $0x1] sm:$0x1] (!%p900_p6) }
 0x12a   : > { %v420_v56 = vmul.f32 (!%p900_p6), %v417_v54, %v417_v54 }
 0x12c   : > { %v421_v57 = vsub.f32 (!%p900_p6), %v419_v55, %v420_v56 }
 0x12e   : > { %v422_v58 = vmax.f32 %v421_v57, 0.0 }
 0x130   : > { %v424_v59 = vadd.f32 1e-05, %v422_v58 }
 0x132   : > { %1080 = vrsqrt.f32 %v424_v59 }
 0x13c   : > { %v1081_v61 = vpop.eup %1080 }
 0x13d   : > { %v426_v62 = vmul.f32 %v1081_v61, %v423_v60 }
 0x13f   : > { %427 = vst [vmem:[#allocation6] sm:$0x1] %v426_v62  ;;  %v429_v0 = vmul.f32 %v426_v62, %v417_v54 }
 0x141   : > { %v430_v1 = vsub.f32 %v428_v63, %v429_v0 }
 0x143   : > { %431 = vst [vmem:[#allocation6 + $0x1] sm:$0x1] %v430_v1 }
 0x144 PF: > { %v1082_v2 = vld [vmem:[%s1427_s2] sm:$0xff]   ;;  %v1083_v3 = vld [vmem:[%s1427_s2 + $0x8] sm:$0xff]   ;;  %s1320_s30 = sshll.u32 %s1170_s18, 6  ;;  %v1084_v4 = vld [vmem:[%s1427_s2 + $0x10] sm:$0xff]   ;;  %v618_v48 = vlaneseq  ;;  %v1189_v62 = vmov 0.0  }
 0x145   : > { %958 = vmatprep.subr.bf16.mxu0 %v1082_v2  ;;  %984 = vmatprep.subr.bf16.mxu1 %v1082_v2  ;;  %v1085_v5 = vld [vmem:[%s1427_s2 + $0x18] sm:$0xff]   ;;  %s433_s11 = scalar_lea.vmem [#allocation7], %s1320_s30  ;;  %v1086_v17 = vld [vmem:[%s1427_s2 + $0x20] sm:$0xff]   ;;  %v1087_v29 = vld [vmem:[%s1427_s2 + $0x28] sm:$0xff]   ;;  %v627_v50 = vstv %s1320_s30  ;;  %s609_s10 = scalar_lea.vmem [#allocation8], %s1320_s30 }
 0x146   : > { %959 = vmatpush3.bf16.msra.mxu0 %v1082_v2  ;;  %992 = vmatpush3.bf16.msra.mxu1 %v1082_v2  ;;  %v434_v6 = vld [vmem:[%s433_s11] sm:$0xff]  ;;  %v435_v7 = vld [vmem:[%s433_s11 + $0x8] sm:$0xff]  ;;  %v436_v22 = vld [vmem:[%s433_s11 + $0x10] sm:$0xff]  ;;  %v619_v49 = vshrl.u32 %v618_v48, 7 }
 0x147   : > { %960 = vmatprep.subr.bf16.mxu0 %v1083_v3  ;;  %985 = vmatprep.subr.bf16.mxu1 %v1083_v3  ;;  %v902_v8 = vld [vmem:[#allocation6] ss:$0 sm:$0xff]  ;;  %v439_v13 = vld [vmem:[%s433_s11 + $0x28] sm:$0xff]  ;;  %v437_v25 = vld [vmem:[%s433_s11 + $0x18] sm:$0xff] }
 0x148   : > { %v447_v9 = vmul.f32 %v902_v8, %v434_v6  ;;  %v448_v10 = vmul.f32 %v902_v8, %v435_v7  ;;  %v438_v12 = vld [vmem:[%s433_s11 + $0x20] sm:$0xff]  ;;  %v452_v18 = vmul.f32 %v902_v8, %v439_v13  ;;  %v440_v27 = vld [vmem:[%s433_s11 + $0x30] sm:$0xff]  ;;  %v441_v28 = vld [vmem:[%s433_s11 + $0x38] sm:$0xff]  ;;  %v449_v31 = vmul.f32 %v902_v8, %v436_v22 }
 0x149   : > { %v451_v16 = vmul.f32 %v902_v8, %v438_v12  ;;  %v450_v32 = vmul.f32 %v902_v8, %v437_v25  ;;  %v453_v34 = vmul.f32 %v902_v8, %v440_v27  ;;  %v454_v35 = vmul.f32 %v902_v8, %v441_v28  ;;  %v1088_v36 = vld [vmem:[%s1427_s2 + $0x30] sm:$0xff]   ;;  %v1089_v41 = vld [vmem:[%s1427_s2 + $0x38] sm:$0xff]  }
 0x14a   : > { %961 = vmatpush3.bf16.msra.mxu0 %v1083_v3  ;;  %993 = vmatpush3.bf16.msra.mxu1 %v1083_v3  ;;  %v903_v11 = vld [vmem:[#allocation6 + $0x1] ss:$0 sm:$0xff]  ;;  %v621_v51 = vadd.s32 16, %v619_v49  ;;  %v620_v52 = vadd.s32 8, %v619_v49  ;;  %v628_v53 = vadd.s32 %v627_v50, %v619_v49  ;;  %v622_v54 = vadd.s32 24, %v619_v49 }
 0x14b   : > { %962 = vmatprep.subr.bf16.mxu0 %v1084_v4  ;;  %986 = vmatprep.subr.bf16.mxu1 %v1084_v4  ;;  %v460_v14 = vadd.f32 %v903_v11, %v447_v9  ;;  %v461_v15 = vadd.f32 %v903_v11, %v448_v10  ;;  %v464_v21 = vadd.f32 %v903_v11, %v451_v16  ;;  %v623_v57 = vadd.s32 32, %v619_v49 }
 0x14c   : > { %v465_v23 = vadd.f32 %v903_v11, %v452_v18  ;;  %v462_v37 = vadd.f32 %v903_v11, %v449_v31  ;;  %v463_v38 = vadd.f32 %v903_v11, %v450_v32  ;;  %v466_v39 = vadd.f32 %v903_v11, %v453_v34 }
 0x14d   : > { %v468_v19 = vmax.f32 %v460_v14, 0.0  ;;  %v469_v20 = vmax.f32 %v461_v15, 0.0  ;;  %v472_v26 = vmax.f32 %v464_v21, 0.0  ;;  %v467_v40 = vadd.f32 %v903_v11, %v454_v35 }
 0x14e   : > { %963 = vmatpush3.bf16.msra.mxu0 %v1084_v4  ;;  %994 = vmatpush3.bf16.msra.mxu1 %v1084_v4  ;;  %v473_v30 = vmax.f32 %v465_v23, 0.0  ;;  %v470_v42 = vmax.f32 %v462_v37, 0.0  ;;  %v471_v43 = vmax.f32 %v463_v38, 0.0  ;;  %v474_v44 = vmax.f32 %v466_v39, 0.0 }
 0x14f   : > { %964 = vmatprep.subr.bf16.mxu0 %v1085_v5  ;;  %987 = vmatprep.subr.bf16.mxu1 %v1085_v5  ;;  %v476_v24 = vpack.c.bf16 %v469_v20, %v468_v19  ;;  %v475_v45 = vmax.f32 %v467_v40, 0.0  ;;  %v630_v55 = vadd.s32 %v627_v50, %v621_v51  ;;  %v629_v56 = vadd.s32 %v627_v50, %v620_v52 }
 0x150   : > { %v478_v33 = vpack.c.bf16 %v473_v30, %v472_v26  ;;  %v477_v46 = vpack.c.bf16 %v471_v43, %v470_v42  ;;  %vm636_vm1 = vcmp.lt.s32.totalorder %v628_v53, 200  ;;  %v631_v58 = vadd.s32 %v627_v50, %v622_v54 }
 0x151   : > { %974 = vmatprep.mubr.bf16.mxu0 %v476_v24  ;;  %v479_v47 = vpack.c.bf16 %v475_v45, %v474_v44  ;;  %v624_v59 = vadd.s32 40, %v619_v49  ;;  %v625_v60 = vadd.s32 48, %v619_v49  ;;  %vm638_vm2 = vcmp.lt.s32.totalorder %v630_v55, 200 }
 0x152   : > { %965 = vmatpush3.bf16.msra.mxu0 %v1085_v5  ;;  %995 = vmatpush3.bf16.msra.mxu1 %v1085_v5  ;;  %vm637_vm3 = vcmp.lt.s32.totalorder %v629_v56, 200  ;;  %v632_v61 = vadd.s32 %v627_v50, %v623_v57  ;;  %v912_v63 = vsel %vm636_vm1, 1.0, %v1189_v62  ;;  %v626_v0 = vadd.s32 56, %v619_v49 }
 0x153   : > { %966 = vmatprep.subr.bf16.mxu0 %v1086_v17  ;;  %988 = vmatprep.subr.bf16.mxu1 %v1086_v17  ;;  %vm639_vm4 = vcmp.lt.s32.totalorder %v631_v58, 200  ;;  %v633_v3 = vadd.s32 %v627_v50, %v624_v59  ;;  %v914_v4 = vsel %vm638_vm2, 1.0, %v1189_v62  ;;  %v913_v6 = vsel %vm637_vm3, 1.0, %v1189_v62  ;;  %v668_v58 = vld [vmem:[#allocation4] sm:$0x1] }
 0x154   : > { %978 = vmatprep.mubr.bf16.mxu1 %v478_v33  ;;  %v634_v7 = vadd.s32 %v627_v50, %v625_v60  ;;  %vm640_vm5 = vcmp.lt.s32.totalorder %v632_v61, 200  ;;  %v915_v12 = vsel %vm639_vm4, 1.0, %v1189_v62  ;;  %v635_v14 = vadd.s32 %v627_v50, %v626_v0  ;;  %v684_v61 = vld [vmem:[#allocation5] sm:$0x1] }
 0x155   : > { %vm641_vm6 = vcmp.lt.s32.totalorder %v633_v3, 200  ;;  %v916_v18 = vsel %vm640_vm5, 1.0, %v1189_v62 }
 0x156   : > { %967 = vmatpush3.bf16.msra.mxu0 %v1086_v17  ;;  %996 = vmatpush3.bf16.msra.mxu1 %v1086_v17  ;;  %vm642_vm7 = vcmp.lt.s32.totalorder %v634_v7, 200  ;;  %vm643_vm8 = vcmp.lt.s32.totalorder %v635_v14, 200  ;;  %v917_v23 = vsel %vm641_vm6, 1.0, %v1189_v62 }
 0x157   : > { %968 = vmatprep.subr.bf16.mxu0 %v1087_v29  ;;  %989 = vmatprep.subr.bf16.mxu1 %v1087_v29  ;;  %v918_v28 = vsel %vm642_vm7, 1.0, %v1189_v62  ;;  %v919_v33 = vsel %vm643_vm8, 1.0, %v1189_v62 }
 0x15a   : > { %969 = vmatpush3.bf16.msra.mxu0 %v1087_v29  ;;  %997 = vmatpush3.bf16.msra.mxu1 %v1087_v29 }
 0x15b   : > { %970 = vmatprep.subr.bf16.mxu0 %v1088_v36  ;;  %990 = vmatprep.subr.bf16.mxu1 %v1088_v36 }
 0x15e   : > { %971 = vmatpush3.bf16.msra.mxu0 %v1088_v36  ;;  %998 = vmatpush3.bf16.msra.mxu1 %v1088_v36 }
 0x15f   : > { %972 = vmatprep.subr.bf16.mxu0 %v1089_v41  ;;  %991 = vmatprep.subr.bf16.mxu1 %v1089_v41 }
 0x162   : > { %973 = vmatpush3.bf16.msra.mxu0 %v1089_v41  ;;  %999 = vmatpush3.bf16.msra.mxu1 %v1089_v41 }
 0x165   : > { %975 = vmatmul.mubr.bf16.vlgmr.msra.gmra.mrb[0].mxu0 %v477_v46  ;;  %979 = vmatmul.mubr.bf16.vlgmr.msra.gmra.mrb[0].mxu1 %v479_v47 }
 0x238   : > { %v976_v1 = vpop.f32.mrb[0].mxu0  ;;  %v980_v2 = vpop.f32.mrb[0].mxu1 }
 0x239   : > { %612 = vst [vmem:[%s609_s10 + $0x10] sm:$0xff] %v976_v1  ;;  %v578_v5 = vpop.f32.mrb[1].mxu0  ;;  %616 = vst [vmem:[%s609_s10 + $0x30] sm:$0xff] %v980_v2  ;;  %v594_v8 = vpop.f32.mrb[1].mxu1  ;;  %v662_v16 = vmul.f32 %v976_v1, %v914_v4  ;;  %v666_v34 = vmul.f32 %v980_v2, %v918_v28 }
 0x23a   : > { %610 = vst [vmem:[%s609_s10] sm:$0xff] %v578_v5  ;;  %v660_v9 = vmul.f32 %v912_v63, %v578_v5  ;;  %v977_v10 = vpop.f32.mrb[2].mxu0  ;;  %614 = vst [vmem:[%s609_s10 + $0x20] sm:$0xff] %v594_v8  ;;  %v981_v11 = vpop.f32.mrb[2].mxu1  ;;  %v664_v27 = vmul.f32 %v916_v18, %v594_v8 }
 0x23b   : > { %613 = vst [vmem:[%s609_s10 + $0x18] sm:$0xff] %v977_v10  ;;  %v581_v13 = vpop.f32.mrb[3].mxu0  ;;  %617 = vst [vmem:[%s609_s10 + $0x38] sm:$0xff] %v981_v11  ;;  %v597_v15 = vpop.f32.mrb[3].mxu1  ;;  %v663_v20 = vmul.f32 %v977_v10, %v915_v12  ;;  %v687_v24 = vmul.f32 %v976_v1, %v662_v16  ;;  %v667_v39 = vmul.f32 %v981_v11, %v919_v33 }
 0x23c   : > { %611 = vst [vmem:[%s609_s10 + $0x8] sm:$0xff] %v581_v13  ;;  %v661_v17 = vmul.f32 %v913_v6, %v581_v13  ;;  %615 = vst [vmem:[%s609_s10 + $0x28] sm:$0xff] %v597_v15  ;;  %v685_v19 = vmul.f32 %v660_v9, %v578_v5  ;;  %v665_v32 = vmul.f32 %v917_v23, %v597_v15 }
 0x23d   : > { %v688_v29 = vmul.f32 %v977_v10, %v663_v20  ;;  %v689_v36 = vmul.f32 %v664_v27, %v594_v8  ;;  %v691_v42 = vmul.f32 %v980_v2, %v666_v34  ;;  %v692_v45 = vmul.f32 %v981_v11, %v667_v39 }
 0x23e   : > { %v669_v21 = vadd.f32 %v661_v17, %v660_v9  ;;  %v686_v22 = vmul.f32 %v661_v17, %v581_v13  ;;  %v690_v41 = vmul.f32 %v665_v32, %v597_v15 }
 0x240   : > { %v670_v25 = vadd.f32 %v669_v21, %v662_v16  ;;  %v693_v26 = vadd.f32 %v686_v22, %v685_v19 }
 0x242   : > { %v694_v30 = vadd.f32 %v693_v26, %v687_v24  ;;  %v671_v31 = vadd.f32 %v670_v25, %v663_v20 }
 0x244   : > { %v672_v35 = vadd.f32 %v671_v31, %v664_v27  ;;  %v695_v37 = vadd.f32 %v694_v30, %v688_v29 }
 0x246   : > { %v696_v38 = vadd.f32 %v695_v37, %v689_v36  ;;  %v673_v40 = vadd.f32 %v672_v35, %v665_v32 }
 0x248   : > { %v674_v43 = vadd.f32 %v673_v40, %v666_v34  ;;  %v697_v44 = vadd.f32 %v696_v38, %v690_v41 }
 0x24a   : > { %v675_v46 = vadd.f32 %v674_v43, %v667_v39  ;;  %v698_v47 = vadd.f32 %v697_v44, %v691_v42 }
 0x24c   : > { %v676_v48 = vrot.slane %v675_v46, 4  ;;  %v699_v49 = vadd.f32 %v698_v47, %v692_v45 }
 0x24e   : > { %v677_v50 = vadd.f32 %v676_v48, %v675_v46  ;;  %v700_v51 = vrot.slane %v699_v49, 4 }
 0x250   : > { %v678_v52 = vrot.slane %v677_v50, 2  ;;  %v701_v53 = vadd.f32 %v700_v51, %v699_v49 }
 0x252   : > { %v679_v54 = vadd.f32 %v678_v52, %v677_v50  ;;  %v702_v55 = vrot.slane %v701_v53, 2 }
 0x254   : > { %v680_v56 = vrot.slane %v679_v54, 1  ;;  %v703_v57 = vadd.f32 %v702_v55, %v701_v53 }
 0x256   : > { %v681_v59 = vadd.f32 %v680_v56, %v679_v54  ;;  %v704_v60 = vrot.slane %v703_v57, 1 }
 0x258   : > { %v682_v62 = vadd.f32 %v681_v59, %v668_v58  ;;  %v705_v63 = vadd.f32 %v704_v60, %v703_v57 }
 0x25a   : > { %683 = vst [vmem:[#allocation4] sm:$0x1] %v682_v62  ;;  %v706_v0 = vadd.f32 %v705_v63, %v684_v61 }
 0x25c   : > { %707 = vst [vmem:[#allocation5] sm:$0x1] %v706_v0 }
 0x25d PF: > { %p920_p9 = scmp.ne.s32.totalorder %s1174_s19, 2 }
 0x25e   : > { %p921_p10 = scmp.ne.s32.totalorder (!%p920_p9), %s1170_s18, 0 }
 0x25f   : > { %711 = sbr.rel (%p920_p9) target bundleno = 658 (0x292), region = 56 }
 0x266   : > { %714 = sbr.rel (%p921_p10) target bundleno = 643 (0x283), region = 60  ;;  %v715_v1 = vld [vmem:[#allocation4] sm:$0x1] (!%p921_p10)  ;;  %v717_v2 = vld [vmem:[#allocation5] sm:$0x1] (!%p921_p10) }
 0x267   : > { %v716_v3 = vmul.f32 (!%p921_p10), 0.005, %v715_v1  ;;  %v718_v4 = vmul.f32 (!%p921_p10), 0.005, %v717_v2  ;;  %v722_v9 = vld [vmem:[%s1428_s3 + $0x2] sm:$0x1] (!%p921_p10) }
 0x268   : > { %v727_v12 = vld [vmem:[%s1428_s3 + $0x3] sm:$0x1] (!%p921_p10) }
 0x269   : > { %v719_v5 = vmul.f32 (!%p921_p10), %v716_v3, %v716_v3 }
 0x26b   : > { %v720_v6 = vsub.f32 (!%p921_p10), %v718_v4, %v719_v5 }
 0x26d   : > { %v721_v7 = vmax.f32 %v720_v6, 0.0 }
 0x26f   : > { %v723_v8 = vadd.f32 1e-05, %v721_v7 }
 0x271   : > { %1090 = vrsqrt.f32 %v723_v8 }
 0x27b   : > { %v1091_v10 = vpop.eup %1090 }
 0x27c   : > { %v725_v11 = vmul.f32 %v1091_v10, %v722_v9 }
 0x27e   : > { %726 = vst [vmem:[#allocation6 + $0x2] sm:$0x1] %v725_v11  ;;  %v728_v13 = vmul.f32 %v725_v11, %v716_v3 }
 0x280   : > { %v729_v14 = vsub.f32 %v727_v12, %v728_v13 }
 0x282   : > { %730 = vst [vmem:[#allocation6 + $0x3] sm:$0x1] %v729_v14 }
 0x283 PF: > { %s922_s14 = sshll.u32 %s1170_s18, 6 }
 0x284   : > { %s732_s23 = scalar_lea.vmem [#allocation8], %s922_s14 }
 0x285   : > { %v923_v15 = vld [vmem:[#allocation6 + $0x2] ss:$0 sm:$0xff]  ;;  %v734_v18 = vld [vmem:[%s732_s23 + $0x8] sm:$0xff]  ;;  %v735_v19 = vld [vmem:[%s732_s23 + $0x10] sm:$0xff] }
 0x286   : > { %v733_v17 = vld [vmem:[%s732_s23] sm:$0xff]  ;;  %v747_v21 = vmul.f32 %v923_v15, %v734_v18  ;;  %v748_v22 = vmul.f32 %v923_v15, %v735_v19  ;;  %v736_v23 = vld [vmem:[%s732_s23 + $0x18] sm:$0xff]  ;;  %v738_v25 = vld [vmem:[%s732_s23 + $0x28] sm:$0xff] }
 0x287   : > { %v746_v20 = vmul.f32 %v923_v15, %v733_v17  ;;  %v737_v24 = vld [vmem:[%s732_s23 + $0x20] sm:$0xff]  ;;  %v749_v26 = vmul.f32 %v923_v15, %v736_v23  ;;  %v751_v28 = vmul.f32 %v923_v15, %v738_v25  ;;  %v739_v29 = vld [vmem:[%s732_s23 + $0x30] sm:$0xff]  ;;  %v740_v30 = vld [vmem:[%s732_s23 + $0x38] sm:$0xff] }
 0x288   : > { %v750_v27 = vmul.f32 %v923_v15, %v737_v24  ;;  %v752_v34 = vmul.f32 %v923_v15, %v739_v29  ;;  %v753_v38 = vmul.f32 %v923_v15, %v740_v30 }
 0x289   : > { %v924_v16 = vld [vmem:[#allocation6 + $0x3] ss:$0 sm:$0xff] }
 0x28a   : > { %v759_v31 = vadd.f32 %v924_v16, %v746_v20  ;;  %v760_v32 = vadd.f32 %v924_v16, %v747_v21  ;;  %v761_v33 = vadd.f32 %v924_v16, %v748_v22  ;;  %v762_v35 = vadd.f32 %v924_v16, %v749_v26 }
 0x28b   : > { %v763_v36 = vadd.f32 %v924_v16, %v750_v27  ;;  %v764_v37 = vadd.f32 %v924_v16, %v751_v28  ;;  %v765_v42 = vadd.f32 %v924_v16, %v752_v34  ;;  %v766_v46 = vadd.f32 %v924_v16, %v753_v38 }
 0x28c   : > { %v767_v39 = vmax.f32 %v759_v31, 0.0  ;;  %v768_v40 = vmax.f32 %v760_v32, 0.0  ;;  %v769_v41 = vmax.f32 %v761_v33, 0.0  ;;  %v770_v43 = vmax.f32 %v762_v35, 0.0 }
 0x28d   : > { %v771_v44 = vmax.f32 %v763_v36, 0.0  ;;  %v772_v45 = vmax.f32 %v764_v37, 0.0  ;;  %v773_v47 = vmax.f32 %v765_v42, 0.0  ;;  %v774_v48 = vmax.f32 %v766_v46, 0.0 }
 0x28e   : > { %775 = vst [vmem:[%s1298_s26] sm:$0xff] %v767_v39  ;;  %776 = vst [vmem:[%s1298_s26 + $0x8] sm:$0xff] %v768_v40 }
 0x28f   : > { %777 = vst [vmem:[%s1298_s26 + $0x10] sm:$0xff] %v769_v41  ;;  %778 = vst [vmem:[%s1298_s26 + $0x18] sm:$0xff] %v770_v43 }
 0x290   : > { %779 = vst [vmem:[%s1298_s26 + $0x20] sm:$0xff] %v771_v44  ;;  %780 = vst [vmem:[%s1298_s26 + $0x28] sm:$0xff] %v772_v45 }
 0x291   : > { %781 = vst [vmem:[%s1298_s26 + $0x30] sm:$0xff] %v773_v47  ;;  %782 = vst [vmem:[%s1298_s26 + $0x38] sm:$0xff] %v774_v48 }
 0x292 PF: > { %p791_p11 = scmp.eq.s32.totalorder %s1174_s19, 2  ;;  %s799_s27 = sshll.u32 %s1298_s26, 4  ;;  %s1364_s27 = int_to_ptr.vmem [resolvable:$true] %s799_s27 }
 0x293   : > { %s1373_s30 = scalar_lea.sflag [#allocation10], %s215_s8  ;;  %s1092_s11 = scalar_lea.vmem %s1364_s27, 1024 }
 0x294   : > { %s1448_s18 = smov (!%p791_p11, %s1170_s18), 0  ;;  %p1093_p12 = scmp.ne.s32.totalorder %s1364_s27, %s1092_s11 }
 0x295   : > { %s930_s5 = sshll.u32 %s1448_s18, 10  ;;  %s1190_s19 = smov [#allocation9]  }
 0x296   : > { %s1369_s10 = scalar_lea.hbm %s1429_s4, %s930_s5  ;;  %p1094_p13 = pnand %p1093_p12, %p1273_p7 }
 0x297   : > { %s1096_s26 = sshll.u32 %s1190_s19, 4  ;;  %s1097_s26 = int_to_ptr.vmem [resolvable:$false] %s1096_s26 }
 0x298   : > { %p1095_p0 = pneg %p1094_p13  ;;  %s1098_s12 = scalar_lea.vmem %s1097_s26, 2048 }
 0x299   : > { %p1099_p1 = scmp.lt.s32.totalorder %s1364_s27, %s1097_s26  ;;  %p1100_p2 = scmp.lt.s32.totalorder %s1098_s12, %s1092_s11 }
 0x29b   : > { %p1101_p3 = por %p1100_p2, %p1099_p1 }
 0x29d   : > { %p1102_p4 = pnand %p1101_p3, %p1095_p0 }
 0x29f   : > { %1105 = shalt.err (!%p1102_p4)
}
 0x2a0   : > { %s1106_s18 = scalar_lea.hbm %s1369_s10, 1024  ;;  %s1110_s14 = scalar_lea.hbm %s1429_s4, 4096 }
 0x2a1   : > { %p1107_p5 = scmp.ne.s32.totalorder %s1369_s10, %s1106_s18  ;;  %p1111_p10 = scmp.lt.u32.totalorder %s1369_s10, %s1429_s4 }
 0x2a2   : > { %p1112_p11 = scmp.lt.u32.totalorder %s1110_s14, %s1106_s18  ;;  %p1114_p13 = scmp.lt.u32.totalorder %s1106_s18, %s1369_s10 }
 0x2a3   : > { %p1108_p6 = pnand %p1107_p5, %p1273_p7 }
 0x2a4   : > { %p1113_p12 = por %p1112_p11, %p1111_p10 }
 0x2a5   : > { %p1109_p9 = pneg %p1108_p6 }
 0x2a6   : > { %p1115_p0 = por %p1114_p13, %p1113_p12 }
 0x2a8   : > { %p1116_p1 = pnand %p1115_p0, %p1109_p9 }
 0x2aa   : > { %1119 = shalt.err (!%p1116_p1)
}
 0x2ab   : > { %s1191_s6 = smov 128   ;;  %s1192_s9 = smov 8  }
 0x2ac   : > { %1000 = dma.vmem_to_hbm [thread:$0]  (%p1273_p7), %s1364_s27, 1024, %s1369_s10, %s1373_s30, %s1191_s6, %s1191_s6, %s1192_s9  }
 0x2ad PF: > { %p1006_p2 = scmp.ge.s32.totalorder %s1186_s22, 2  ;;  %s814_s11 = sand.u32 1, %s1158_s15  }
 0x2ae   : > { %s815_s19 = scalar_lea.sflag [#allocation10], %s814_s11 }
 0x2af   : > { %p1003_p3 = pnand %p1006_p2, %p1277_p8 }
 0x2b1   : > { %1153 = dma.done.wait (!%p1003_p3), %s815_s19, 1024  }
 0x2b2   : > { %1155 = vsyncadd (!%p1003_p3), %s815_s19, 4294966272  ;;  %s17_s22 = sadd.s32 1, %s1186_s22   ;;  %s1432_s15 = smov %s1162_s16 }
 0x2b3   : > { %p14_p4 = scmp.ge.s32.totalorder %s17_s22, 14   ;;  %s1433_s16 = smov %s1166_s17 }
 0x2b4   : > { %s1434_s17 = smov %s1287_s7  ;;  %s1435_s18 = smov %s1178_s20 }
 0x2b5   : > { %s1436_s19 = smov %s1182_s21  ;;  %s1437_s20 = smov %s1440_s24 }
 0x2b6   : > { %s1438_s21 = smov %s1444_s25  ;;  %16 = sbr.rel (!%p14_p4) target bundleno = 5 (0x5), region = 99 }
 0x2bd   :  { %820 = vsyncpa [#allocation10], 1 }
 0x2be   :  { %822 = vsyncpa [#allocation10 + $0x1], 1 }

</bundles_post_ra>
